<compile_context>
chip_gen: v7x
topology: tpu7x:2x2x1
jax: 0.10.0
libtpu: 0.0.40
codegen_flags: <defaults>
</compile_context>

<pallas_src>
import jax
import jax.numpy as jnp
from jax.experimental import pallas as pl
from jax.experimental.pallas import tpu as pltpu


def snorm_kernel(x_ref, g_ref, b_ref, o_ref):
    # x_ref: (N, Lt) tile; g_ref / b_ref: (1, Lt) pre-broadcast per-lane gamma / beta.
    x = x_ref[...].astype(jnp.float32)                       # (N, Lt)
    n = x.shape[0]

    mean = jnp.mean(x, axis=0, keepdims=True)                # (1, Lt)
    d = x - mean
    # unbiased variance (divide by N-1), matching torch.var(unbiased=True)
    var = jnp.sum(d * d, axis=0, keepdims=True) * (1.0 / (n - 1))

    inv = jax.lax.rsqrt(var + 1e-5)                          # EUP rsqrt (no divide)
    scale = g_ref[...] * inv                                 # (1, Lt)
    shift = b_ref[...] - mean * scale                        # (1, Lt)
    o_ref[...] = (x * scale + shift).astype(o_ref.dtype)


def snorm(x, gamma, beta, *, lane_tile=None, target_tile_bytes=2 * 1024 * 1024):
    B, C, N, T = x.shape
    assert N >= 2, "unbiased variance over dim 2 requires N >= 2"
    L = B * C * T

    # Lane-dense 2-D view: reduction axis N on sublanes, (B, C, T) flattened on lanes.
    x2d = jnp.transpose(x, (2, 0, 1, 3)).reshape(N, L)

    # Pre-broadcast per-channel affine params to a single (1, L) lane row (row-major
    # over (B, C, T), so lane l's channel is (l // T) % C).
    g_row = jnp.broadcast_to(gamma.reshape(1, C, 1).astype(jnp.float32), (B, C, T)).reshape(1, L)
    b_row = jnp.broadcast_to(beta.reshape(1, C, 1).astype(jnp.float32), (B, C, T)).reshape(1, L)

    # Pick a lane tile: ~target_tile_bytes of f32 per input tile, multiple of 128,
    # no larger than the (128-rounded) problem. Safe for v7x VMEM with double buffering.
    if lane_tile is None:
        lane_tile = max(128, (target_tile_bytes // (N * 4)) // 128 * 128)
    lane_tile = max(128, min(lane_tile, -(-L // 128) * 128) // 128 * 128)

    # Pad lanes so every block is fully in-bounds (gamma padded with 1, beta with 0).
    L_pad = -(-L // lane_tile) * lane_tile
    if L_pad != L:
        pad = L_pad - L
        x2d = jnp.pad(x2d, ((0, 0), (0, pad)))
        g_row = jnp.pad(g_row, ((0, 0), (0, pad)), constant_values=1.0)
        b_row = jnp.pad(b_row, ((0, 0), (0, pad)))
    grid_l = L_pad // lane_tile

    out2d = pl.pallas_call(
        snorm_kernel,
        out_shape=jax.ShapeDtypeStruct((N, L_pad), x.dtype),
        grid=(grid_l,),
        in_specs=[
            pl.BlockSpec((N, lane_tile), lambda i: (0, i)),        # x slab
            pl.BlockSpec((1, lane_tile), lambda i: (0, i)),        # gamma row
            pl.BlockSpec((1, lane_tile), lambda i: (0, i)),        # beta row
        ],
        out_specs=pl.BlockSpec((N, lane_tile), lambda i: (0, i)),
        compiler_params=pltpu.CompilerParams(
            dimension_semantics=("parallel",)),
    )(x2d, g_row, b_row)

    if L_pad != L:
        out2d = out2d[:, :L]
    return out2d.reshape(N, B, C, T).transpose(1, 2, 0, 3)


def snorm_ref(x, gamma, beta):
    mean = jnp.mean(x, axis=2, keepdims=True)
    var = jnp.var(x, axis=2, keepdims=True, ddof=1)  # unbiased
    x_norm = (x - mean) / jnp.sqrt(var + 1e-5)
    return x_norm * gamma.reshape(1, -1, 1, 1) + beta.reshape(1, -1, 1, 1)


if __name__ == "__main__":
    key = jax.random.PRNGKey(0)

    # Test 1: module-sized small shape, single-tile grid.
    B, C, N, T = 2, 4, 16, 16
    k1, k2, k3, key = jax.random.split(key, 4)
    x = jax.random.normal(k1, (B, C, N, T), dtype=jnp.float32)
    gamma = 1.0 + 0.1 * jax.random.normal(k2, (C,), dtype=jnp.float32)
    beta = 0.1 * jax.random.normal(k3, (C,), dtype=jnp.float32)

    out = jax.block_until_ready(snorm(x, gamma, beta))
    ref = snorm_ref(x, gamma, beta)
    assert out.shape == ref.shape and out.dtype == ref.dtype
    assert jnp.allclose(out, ref, atol=1e-4, rtol=1e-4)

    # Test 2: multi-tile lane grid (explicit small tile to exercise the pipeline).
    B2, C2, N2, T2 = 2, 8, 24, 64
    k1, k2, k3, key = jax.random.split(key, 4)
    x2 = jax.random.normal(k1, (B2, C2, N2, T2), dtype=jnp.float32)
    gamma2 = 1.0 + 0.1 * jax.random.normal(k2, (C2,), dtype=jnp.float32)
    beta2 = 0.1 * jax.random.normal(k3, (C2,), dtype=jnp.float32)

    out2 = jax.block_until_ready(snorm(x2, gamma2, beta2, lane_tile=256))
    ref2 = snorm_ref(x2, gamma2, beta2)
    assert out2.shape == ref2.shape and out2.dtype == ref2.dtype
    assert jnp.allclose(out2, ref2, atol=1e-4, rtol=1e-4)

    print("KERNEL_OK")
</pallas_src>

<mosaic_0001>
module attributes {stable_mosaic.version = 11 : i64} {
  func.func @snorm_kernel(%arg0: i32, %arg1: memref<16x128xf32, #tpu.memory_space<vmem>>, %arg2: memref<1x128xf32, #tpu.memory_space<vmem>>, %arg3: memref<1x128xf32, #tpu.memory_space<vmem>>, %arg4: memref<16x128xf32, #tpu.memory_space<vmem>>) attributes {dimension_semantics = [#tpu.dimension_semantics<parallel>], iteration_bounds = array<i64: 1>, scalar_prefetch = 0 : i64, scratch_operands = 0 : i64, tpu.core_type = #tpu.core_type<tc>, window_params = [{transform_indices = @transform_0, window_bounds = array<i64: 16, 128>}, {transform_indices = @transform_1, window_bounds = array<i64: 1, 128>}, {transform_indices = @transform_2, window_bounds = array<i64: 1, 128>}, {transform_indices = @transform_3, window_bounds = array<i64: 16, 128>}]} {
    %c0 = arith.constant 0 : index
    %c0_0 = arith.constant 0 : index
    %0 = vector.load %arg1[%c0, %c0_0] : memref<16x128xf32, #tpu.memory_space<vmem>>, vector<16x128xf32>
    %cst = arith.constant dense<0.000000e+00> : vector<128xf32>
    %1 = vector.multi_reduction <add>, %0, %cst [0] : vector<16x128xf32> to vector<128xf32>
    %2 = vector.shape_cast %1 : vector<128xf32> to vector<1x128xf32>
    %cst_1 = arith.constant 1.600000e+01 : f32
    %3 = vector.broadcast %cst_1 : f32 to vector<1x128xf32>
    %4 = arith.divf %2, %3 : vector<1x128xf32>
    %5 = vector.broadcast %4 : vector<1x128xf32> to vector<16x128xf32>
    %6 = arith.subf %0, %5 : vector<16x128xf32>
    %7 = arith.mulf %6, %6 : vector<16x128xf32>
    %cst_2 = arith.constant dense<0.000000e+00> : vector<128xf32>
    %8 = vector.multi_reduction <add>, %7, %cst_2 [0] : vector<16x128xf32> to vector<128xf32>
    %9 = vector.shape_cast %8 : vector<128xf32> to vector<1x128xf32>
    %cst_3 = arith.constant 0.0666666701 : f32
    %10 = vector.broadcast %cst_3 : f32 to vector<1x128xf32>
    %11 = arith.mulf %9, %10 : vector<1x128xf32>
    %cst_4 = arith.constant 9.99999974E-6 : f32
    %12 = vector.broadcast %cst_4 : f32 to vector<1x128xf32>
    %13 = arith.addf %11, %12 : vector<1x128xf32>
    %14 = math.rsqrt %13 : vector<1x128xf32>
    %c0_5 = arith.constant 0 : index
    %c0_6 = arith.constant 0 : index
    %15 = vector.load %arg2[%c0_5, %c0_6] : memref<1x128xf32, #tpu.memory_space<vmem>>, vector<1x128xf32>
    %16 = arith.mulf %15, %14 : vector<1x128xf32>
    %c0_7 = arith.constant 0 : index
    %c0_8 = arith.constant 0 : index
    %17 = vector.load %arg3[%c0_7, %c0_8] : memref<1x128xf32, #tpu.memory_space<vmem>>, vector<1x128xf32>
    %18 = arith.mulf %4, %16 : vector<1x128xf32>
    %19 = arith.subf %17, %18 : vector<1x128xf32>
    %20 = vector.broadcast %16 : vector<1x128xf32> to vector<16x128xf32>
    %21 = arith.mulf %0, %20 : vector<16x128xf32>
    %22 = vector.broadcast %19 : vector<1x128xf32> to vector<16x128xf32>
    %23 = arith.addf %21, %22 : vector<16x128xf32>
    %c0_9 = arith.constant 0 : index
    %c0_10 = arith.constant 0 : index
    %24 = vector.load %arg4[%c0_9, %c0_10] : memref<16x128xf32, #tpu.memory_space<vmem>>, vector<16x128xf32>
    tpu.vector_store %arg4[%c0_9, %c0_10], %23 {strides = array<i32>} : memref<16x128xf32, #tpu.memory_space<vmem>>, vector<16x128xf32>,
    return
  }
  func.func @transform_0(%arg0: i32) -> (i32, i32) {
    %c0_i32 = arith.constant 0 : i32
    %c0_i32_0 = arith.constant 0 : i32
    return %c0_i32, %arg0 : i32, i32
  }
  func.func @transform_1(%arg0: i32) -> (i32, i32) {
    %c0_i32 = arith.constant 0 : i32
    %c0_i32_0 = arith.constant 0 : i32
    return %c0_i32, %arg0 : i32, i32
  }
  func.func @transform_2(%arg0: i32) -> (i32, i32) {
    %c0_i32 = arith.constant 0 : i32
    %c0_i32_0 = arith.constant 0 : i32
    return %c0_i32, %arg0 : i32, i32
  }
  func.func @transform_3(%arg0: i32) -> (i32, i32) {
    %c0_i32 = arith.constant 0 : i32
    %c0_i32_0 = arith.constant 0 : i32
    return %c0_i32, %arg0 : i32, i32
  }
}

</mosaic_0001>

<bundles_post_ra>
// kernel: tpu_custom_call.1
= control target key start
LH: loop header
LB: loop body
LE: loop exit
PB: predicated region body
PF: predicated region fallthrough
CT: control target
= control target key end

     0   :  { %8 = vsyncpa [#allocation3], 0  ;;  %s208_s0 = inlined_call_operand.hbm [shape: f32[16,128], index: 0, kind: input, shape index: {}]   ;;  %s209_s1 = inlined_call_operand.vmem [shape: f32[1,128], index: 1, kind: input, shape index: {}]   ;;  %s210_s2 = inlined_call_operand.vmem [shape: f32[1,128], index: 2, kind: input, shape index: {}]   ;;  %s211_s3 = inlined_call_operand.hbm [shape: f32[16,128], index: 3, kind: output, shape index: {}]  }
   0x1   :  { %9 = vsyncpa [#allocation4], 0  ;;  %s148_s12 = smov [#allocation2]   ;;  %s100_s16 = scalar_lea.hbm %s208_s0, 256 }
   0x2   :  { %s15_s13 = sshll.u32 %s148_s12, 4  ;;  %p101_p0 = scmp.ne.s32.totalorder %s208_s0, %s100_s16  ;;  %s16_s13 = int_to_ptr.vmem [resolvable:$true] %s15_s13 }
   0x3   :  { %p104_p1 = scmp.lt.u32.totalorder %s100_s16, %s208_s0 }
   0x5   :  { %p106_p2 = pnand %p104_p1, %p101_p0 }
   0x7   :  { %109 = shalt.err (!%p106_p2)
}
   0x8   :  { %s110_s21 = scalar_lea.vmem %s16_s13, 256  ;;  %p115_p4 = scmp.lt.s32.totalorder %s16_s13, %s16_s13 }
   0x9   :  { %p111_p3 = scmp.ne.s32.totalorder %s16_s13, %s110_s21  ;;  %p116_p5 = scmp.lt.s32.totalorder %s110_s21, %s110_s21 }
   0xb   :  { %p117_p6 = por %p116_p5, %p115_p4 }
   0xd   :  { %p118_p7 = pnand %p117_p6, %p111_p3 }
   0xf   :  { %121 = shalt.err (!%p118_p7)
}
  0x10   :  { %s149_s22 = smov 128   ;;  %s150_s23 = smov 8  }
  0x11   :  { %21 = dma.hbm_to_vmem [thread:$0]  %s208_s0, 256, %s16_s13, [#allocation3], %s149_s22, %s149_s22, %s150_s23  }
  0x12   :  { %144 = dma.done.wait [#allocation3], 256  }
  0x13   :  { %145 = vsyncadd [#allocation3], 4294967040  ;;  %v29_v0 = vld [vmem:[#allocation2] sm:$0xff]  ;;  %v30_v1 = vld [vmem:[#allocation2 + $0x8] sm:$0xff]  ;;  %v60_v23 = vlaneseq  ;;  %s151_s29 = smov [#allocation5]  }
  0x14   :  { %v31_v2 = vadd.f32 %v30_v1, %v29_v0  ;;  %v54_v25 = vld [vmem:[%s209_s1] sm:$0x1]  ;;  %s82_s30 = sshll.u32 %s151_s29, 4  ;;  %s83_s30 = int_to_ptr.vmem [resolvable:$true] %s82_s30 }
  0x15   :  { %v61_v24 = vshrl.u32 %v60_v23, 7  ;;  %v56_v29 = vld [vmem:[%s210_s2] sm:$0x1]  ;;  %s122_s1 = scalar_lea.vmem %s83_s30, 256  ;;  %p127_p9 = scmp.lt.s32.totalorder %s83_s30, %s83_s30 }
  0x16   :  { %v32_v3 = vrot.slane %v31_v2, 4  ;;  %p123_p8 = scmp.ne.s32.totalorder %s83_s30, %s122_s1  ;;  %p128_p10 = scmp.lt.s32.totalorder %s122_s1, %s122_s1 }
  0x17   :  { %v62_v26 = vsub.s32 0, %v61_v24 }
  0x18   :  { %v33_v4 = vadd.f32 %v32_v3, %v31_v2  ;;  %p129_p11 = por %p128_p10, %p127_p9 }
  0x1a   :  { %v34_v5 = vrot.slane %v33_v4, 2  ;;  %p130_p12 = pnand %p129_p11, %p123_p8 }
  0x1c   :  { %v35_v6 = vadd.f32 %v34_v5, %v33_v4 }
  0x1e   :  { %v36_v7 = vrot.slane %v35_v6, 1 }
  0x20   :  { %v37_v8 = vadd.f32 %v36_v7, %v35_v6 }
  0x22   :  { %v39_v9 = vmul.f32 0.0625, %v37_v8 }
  0x24   :  { %v40_v10 = vsub.f32 %v29_v0, %v39_v9  ;;  %v41_v11 = vsub.f32 %v30_v1, %v39_v9 }
  0x26   :  { %v42_v12 = vmul.f32 %v40_v10, %v40_v10  ;;  %v43_v13 = vmul.f32 %v41_v11, %v41_v11 }
  0x28   :  { %v44_v14 = vadd.f32 %v43_v13, %v42_v12 }
  0x2a   :  { %v45_v15 = vrot.slane %v44_v14, 4 }
  0x2c   :  { %v46_v16 = vadd.f32 %v45_v15, %v44_v14 }
  0x2e   :  { %v47_v17 = vrot.slane %v46_v16, 2 }
  0x30   :  { %v48_v18 = vadd.f32 %v47_v17, %v46_v16 }
  0x32   :  { %v49_v19 = vrot.slane %v48_v18, 1 }
  0x34   :  { %v50_v20 = vadd.f32 %v49_v19, %v48_v18 }
  0x36   :  { %v51_v21 = vmul.f32 0.06666667, %v50_v20 }
  0x38   :  { %v52_v22 = vadd.f32 1e-05, %v51_v21 }
  0x3a   :  { %98 = vrsqrt.f32 %v52_v22 }
  0x44   :  { %v99_v27 = vpop.eup %98 }
  0x45   :  { %v55_v28 = vmul.f32 %v99_v27, %v54_v25 }
  0x47   :  { %v57_v30 = vmul.f32 %v55_v28, %v39_v9  ;;  %v63_v31 = vrot.slane %v55_v28, %v62_v26 }
  0x49   :  { %v58_v32 = vsub.f32 %v56_v29, %v57_v30  ;;  %v65_v33 = vmul.f32 %v63_v31, %v29_v0  ;;  %v66_v34 = vmul.f32 %v63_v31, %v30_v1 }
  0x4b   :  { %v71_v35 = vrot.slane %v58_v32, %v62_v26 }
  0x4d   :  { %v73_v36 = vadd.f32 %v71_v35, %v65_v33  ;;  %v74_v37 = vadd.f32 %v71_v35, %v66_v34 }
  0x4f   :  { %75 = vst [vmem:[#allocation5] sm:$0xff] %v73_v36  ;;  %76 = vst [vmem:[#allocation5 + $0x8] sm:$0xff] %v74_v37 }
  0x50   :  { %133 = shalt.err (!%p130_p12)
}
  0x51   :  { %s134_s5 = scalar_lea.hbm %s211_s3, 256 }
  0x52   :  { %p135_p13 = scmp.ne.s32.totalorder %s211_s3, %s134_s5  ;;  %p138_p0 = scmp.lt.u32.totalorder %s134_s5, %s211_s3 }
  0x54   :  { %p140_p1 = pnand %p138_p0, %p135_p13 }
  0x56   :  { %143 = shalt.err (!%p140_p1)
}
  0x57   :  { %88 = dma.vmem_to_hbm [thread:$0]  %s83_s30, 256, %s211_s3, [#allocation4], %s149_s22, %s149_s22, %s150_s23  }
  0x58   :  { %146 = dma.done.wait [#allocation4], 256  }
  0x59   :  { %147 = vsyncadd [#allocation4], 4294967040 }
  0x5a   :  { %92 = vsyncpa [#allocation3], 1 }
  0x5b   :  { %93 = vsyncpa [#allocation4], 1 }

</bundles_post_ra>
